<compile_context>
chip_gen: v7x
topology: tpu7x:2x2x1
jax: 0.10.0
libtpu: 0.0.40
codegen_flags: <defaults>
</compile_context>

<pallas_src>
import functools

import jax
import jax.numpy as jnp
from jax.experimental import pallas as pl
from jax.experimental.pallas import tpu as pltpu

LANES = 128
SUBLANES = 8
MAX_TILE_ROWS = 4096                 # (4096, 128) f32 block = 2 MiB per input
_FUSED_MAX_BYTES = 2 * 1024 * 1024   # conservative: keeps fused-path VMEM temporaries small


def _round_up(x, m):
    return -(-x // m) * m


# ---------------------------------------------------------------------------
# Tiled pass 1: delta = threshold * max(|t - p| over valid elements)
# ---------------------------------------------------------------------------
def _max_kernel(threshold, tile_rows, tail_rows, has_mask, *refs):
    if has_mask:
        t_ref, p_ref, m_ref, delta_ref, acc = refs
    else:
        t_ref, p_ref, delta_ref, acc = refs
        m_ref = None
    step = pl.program_id(0)
    last = pl.num_programs(0) - 1
    groups = tile_rows // SUBLANES

    @pl.when(step == 0)
    def _init():
        acc[...] = jnp.zeros_like(acc)

    def accumulate(row_limit):
        t = t_ref[...].astype(jnp.float32)
        p = p_ref[...].astype(jnp.float32)
        valid = t > 0.0
        if has_mask:
            valid = valid & (m_ref[...] != 0)
        if row_limit is not None:
            # Static bound: rows >= row_limit in this (last, partial) block hold
            # stale data from the partial DMA and must not contribute.
            row_ids = jax.lax.broadcasted_iota(jnp.int32, valid.shape, 0)
            valid = valid & (row_ids < row_limit)
        diff = jnp.where(valid, jnp.abs(t - p), 0.0)           # 0 is neutral for max
        # VPU tree-reduce of the tile down to one (8,128) vreg, then fold into
        # the small accumulator (no full-tile accumulator load/store).
        tile_max = jnp.max(diff.reshape((groups, SUBLANES, LANES)), axis=0)
        acc[...] = jnp.maximum(acc[...], tile_max)

    if tail_rows is None:
        accumulate(None)
    else:
        @pl.when(step != last)
        def _interior():
            accumulate(None)

        @pl.when(step == last)
        def _tail():
            accumulate(tail_rows)

    @pl.when(step == last)
    def _finalize():
        delta_ref[...] = jnp.full(delta_ref.shape,
                                  jnp.float32(threshold) * jnp.max(acc[...]),
                                  jnp.float32)


# ---------------------------------------------------------------------------
# Tiled pass 2: sum of BerHu terms + valid count, given delta / 1/(2*delta)
# ---------------------------------------------------------------------------
def _sum_kernel(tile_rows, tail_rows, has_mask, *refs):
    if has_mask:
        scal_ref, t_ref, p_ref, m_ref, sum_ref, cnt_ref, sum_acc, cnt_acc = refs
    else:
        scal_ref, t_ref, p_ref, sum_ref, cnt_ref, sum_acc, cnt_acc = refs
        m_ref = None
    step = pl.program_id(0)
    last = pl.num_programs(0) - 1
    groups = tile_rows // SUBLANES

    @pl.when(step == 0)
    def _init():
        sum_acc[...] = jnp.zeros_like(sum_acc)
        cnt_acc[...] = jnp.zeros_like(cnt_acc)

    delta = scal_ref[0]
    inv_2delta = scal_ref[1]

    def accumulate(row_limit):
        t = t_ref[...].astype(jnp.float32)
        p = p_ref[...].astype(jnp.float32)
        valid = t > 0.0
        if has_mask:
            valid = valid & (m_ref[...] != 0)
        if row_limit is not None:
            row_ids = jax.lax.broadcasted_iota(jnp.int32, valid.shape, 0)
            valid = valid & (row_ids < row_limit)
        # Zero diff for invalid elements up front: such an element then has
        # diff == 0 < delta -> part1 = 0, part2 = 0, so no trailing where(valid,...)
        # is needed; it is also excluded from the count below.
        diff = jnp.where(valid, jnp.abs(t - p), 0.0)
        # part1 = diff                          where diff <  delta
        # part2 = (diff^2 + delta^2)/(2*delta)  where diff >  delta
        # diff == delta contributes 0 (matches F.threshold's strict '>')
        part1 = jnp.where(diff < delta, diff, 0.0)
        part2 = jnp.where(diff > delta, (diff * diff + delta * delta) * inv_2delta, 0.0)
        val = part1 + part2
        shaped = (groups, SUBLANES, LANES)
        sum_acc[...] = sum_acc[...] + jnp.sum(val.reshape(shaped), axis=0)
        cnt_acc[...] = cnt_acc[...] + jnp.sum(
            valid.astype(jnp.float32).reshape(shaped), axis=0)

    if tail_rows is None:
        accumulate(None)
    else:
        @pl.when(step != last)
        def _interior():
            accumulate(None)

        @pl.when(step == last)
        def _tail():
            accumulate(tail_rows)

    @pl.when(step == last)
    def _finalize():
        sum_ref[...] = jnp.full(sum_ref.shape, jnp.sum(sum_acc[...]), jnp.float32)
        cnt_ref[...] = jnp.full(cnt_ref.shape, jnp.sum(cnt_acc[...]), jnp.float32)


# ---------------------------------------------------------------------------
# Fused single-call path for small inputs: whole slab VMEM-resident,
# one HBM read, both "passes" inside one kernel.
# ---------------------------------------------------------------------------
def _fused_kernel(threshold, has_mask, *refs):
    if has_mask:
        t_hbm, p_hbm, m_hbm, out_ref, t_v, p_v, m_v, sem = refs
    else:
        t_hbm, p_hbm, out_ref, t_v, p_v, sem = refs
        m_hbm = m_v = None

    copies = [pltpu.make_async_copy(t_hbm, t_v, sem.at[0]),
              pltpu.make_async_copy(p_hbm, p_v, sem.at[1])]
    if has_mask:
        copies.append(pltpu.make_async_copy(m_hbm, m_v, sem.at[2]))
    for c in copies:
        c.start()
    for c in copies:
        c.wait()

    t = t_v[...].astype(jnp.float32)
    p = p_v[...].astype(jnp.float32)
    valid = t > 0.0
    if has_mask:
        valid = valid & (m_v[...] != 0)
    diff = jnp.where(valid, jnp.abs(t - p), 0.0)
    delta = jnp.float32(threshold) * jnp.max(diff)
    inv_2delta = jnp.float32(0.5) / delta
    part1 = jnp.where(diff < delta, diff, 0.0)
    part2 = jnp.where(diff > delta, (diff * diff + delta * delta) * inv_2delta, 0.0)
    total = jnp.sum(part1 + part2)
    count = jnp.sum(valid.astype(jnp.float32))
    # count == 0 (or delta == 0) reproduces the reference 0/0 behavior.
    out_ref[...] = jnp.full(out_ref.shape, total / count, jnp.float32)


# ---------------------------------------------------------------------------
# Wrapper
# ---------------------------------------------------------------------------
def _as_slab(x, rows):
    """Flatten to a lane-dense (rows, 128) slab; keep f32/bf16, cast otherwise."""
    if x.dtype in (jnp.float32, jnp.bfloat16):
        flat = x.reshape(-1)
    else:
        flat = x.reshape(-1).astype(jnp.float32)
    pad = rows * LANES - flat.shape[0]
    if pad:
        # zero pad -> target == 0 -> invalid -> contributes nothing, not counted
        flat = jnp.pad(flat, (0, pad))
    return flat.reshape(rows, LANES)


def _mask_slab(m, rows):
    flat = (m.reshape(-1) != 0).astype(jnp.int8)     # int8: 4x less HBM traffic
    pad = rows * LANES - flat.shape[0]
    if pad:
        flat = jnp.pad(flat, (0, pad))
    return flat.reshape(rows, LANES)


@functools.partial(jax.jit, static_argnames=("threshold", "fused", "max_tile_rows"))
def berhu_loss(target, pred, mask=None, threshold=0.2, *, fused=None,
               max_tile_rows=MAX_TILE_ROWS):
    assert pred.ndim == target.ndim, "inconsistent dimensions"
    n = int(target.size)
    rows = _round_up(-(-n // LANES), SUBLANES)       # lane-dense rows, sublane aligned

    t2 = _as_slab(target, rows)
    p2 = _as_slab(pred, rows)
    has_mask = mask is not None
    inputs = [t2, p2]
    if has_mask:
        inputs.append(_mask_slab(mask, rows))

    in_bytes = sum(int(a.size) * a.dtype.itemsize for a in inputs)
    use_fused = (in_bytes <= _FUSED_MAX_BYTES) if fused is None else bool(fused)

    out8 = jax.ShapeDtypeStruct((SUBLANES, LANES), jnp.float32)
    out8_spec = pl.BlockSpec((SUBLANES, LANES), lambda i: (0, 0))

    # ---- fused single-call path (everything resident in VMEM) ----
    if use_fused:
        loss = pl.pallas_call(
            functools.partial(_fused_kernel, float(threshold), has_mask),
            out_shape=out8,
            grid=(1,),
            in_specs=[pl.BlockSpec(memory_space=pl.ANY)] * len(inputs),
            out_specs=out8_spec,
            scratch_shapes=[pltpu.VMEM((rows, LANES), a.dtype) for a in inputs]
                           + [pltpu.SemaphoreType.DMA((len(inputs),))],
            compiler_params=pltpu.CompilerParams(
                dimension_semantics=("arbitrary",),
                vmem_limit_bytes=32 * 1024 * 1024),
        )(*inputs)
        return loss[0, 0]

    # ---- general two-pass tiled path ----
    tile_rows = max(SUBLANES, min(int(max_tile_rows), rows))
    tile_rows -= tile_rows % SUBLANES
    if tile_rows < rows:
        # Multi-block: align the block's sublane dim to 32 so f32 / bf16 / int8
        # (mask) blocks are all legal tilings.
        tile_rows = min(rows, max(32, tile_rows - tile_rows % 32))
    num_blocks = -(-rows // tile_rows)
    tail = rows - (num_blocks - 1) * tile_rows
    tail_rows = None if tail == tile_rows else tail  # ragged last block?

    tile_specs = [pl.BlockSpec((tile_rows, LANES), lambda i: (i, 0)) for _ in inputs]
    smem_spec = pl.BlockSpec(memory_space=pltpu.MemorySpace.SMEM)
    acc8 = pltpu.VMEM((SUBLANES, LANES), jnp.float32)

    step_bytes = tile_rows * LANES * sum(a.dtype.itemsize for a in inputs)
    cparams = pltpu.CompilerParams(
        dimension_semantics=("arbitrary",),
        vmem_limit_bytes=max(2 * step_bytes + (6 << 20), 12 << 20))

    # pass 1: delta
    delta_out = pl.pallas_call(
        functools.partial(_max_kernel, float(threshold), tile_rows, tail_rows, has_mask),
        out_shape=out8,
        grid=(num_blocks,),
        in_specs=tile_specs,
        out_specs=out8_spec,
        scratch_shapes=[acc8],
        compiler_params=cparams,
    )(*inputs)
    delta = delta_out[0, 0]
    # delta == 0 makes 0.5/delta inf; the inf branch is never selected in the
    # forward pass (matches the JAX reference). Do not differentiate this path.
    scalars = jnp.stack([delta, jnp.float32(0.5) / delta]).astype(jnp.float32)

    # pass 2: masked sum of BerHu terms + valid count
    sum_out, cnt_out = pl.pallas_call(
        functools.partial(_sum_kernel, tile_rows, tail_rows, has_mask),
        out_shape=(out8, out8),
        grid=(num_blocks,),
        in_specs=[smem_spec] + tile_specs,
        out_specs=(out8_spec, out8_spec),
        scratch_shapes=[acc8, acc8],
        compiler_params=cparams,
    )(scalars, *inputs)

    # NOTE: zero valid elements yields 0/0 (NaN), same as the reference.
    return (sum_out[0, 0] / cnt_out[0, 0]).astype(jnp.float32)


# ---------------------------------------------------------------------------
# Pure-JAX reference (sanity check only)
# ---------------------------------------------------------------------------
def berhu_loss_ref(target, pred, mask=None, threshold=0.2):
    target = target.astype(jnp.float32)
    pred = pred.astype(jnp.float32)
    valid = target > 0
    if mask is not None:
        valid = valid & (mask != 0)
    diff = jnp.abs(target - pred)
    diff_m = jnp.where(valid, diff, 0.0)
    delta = jnp.float32(threshold) * jnp.max(diff_m)
    part1 = jnp.where(diff < delta, diff, 0.0)
    part2 = jnp.where(diff > delta, (diff * diff + delta * delta) / (2.0 * delta), 0.0)
    val = jnp.where(valid, part1 + part2, 0.0)
    return jnp.sum(val) / jnp.sum(valid.astype(jnp.float32))


if __name__ == "__main__":
    key = jax.random.PRNGKey(0)
    k1, k2, k3, k4, k5, k6, k7, k8 = jax.random.split(key, 8)

    B, C, H, W = 2, 4, 16, 16   # NCHW depth maps, like the PyTorch module
    target = jax.random.uniform(k1, (B, C, H, W), jnp.float32, -0.5, 1.5)
    pred = jax.random.uniform(k2, (B, C, H, W), jnp.float32, 0.0, 1.0)
    mask = (jax.random.uniform(k3, (B, C, H, W), jnp.float32) > 0.25).astype(jnp.float32)

    # ragged (non-128-divisible) shape
    tgt2 = jax.random.uniform(k4, (2, 3, 15, 17), jnp.float32, -0.5, 1.5)
    prd2 = jax.random.uniform(k5, (2, 3, 15, 17), jnp.float32, 0.0, 1.0)

    # shape chosen so the forced tiled path has >1 block and a ragged last block
    tgt3 = jax.random.uniform(k6, (2, 4, 18, 32), jnp.float32, -0.5, 1.5)
    prd3 = jax.random.uniform(k7, (2, 4, 18, 32), jnp.float32, 0.0, 1.0)
    msk3 = (jax.random.uniform(k8, (2, 4, 18, 32), jnp.float32) > 0.25).astype(jnp.float32)

    checks = [
        # fused single-call path
        (berhu_loss(target, pred, mask, threshold=0.2),
         berhu_loss_ref(target, pred, mask, threshold=0.2)),
        (berhu_loss(target, pred, threshold=0.2),
         berhu_loss_ref(target, pred, None, threshold=0.2)),
        (berhu_loss(tgt2, prd2, threshold=0.2),
         berhu_loss_ref(tgt2, prd2, None, threshold=0.2)),
        # forced two-pass tiled path: multi-block + ragged last-block tail mask
        (berhu_loss(tgt3, prd3, msk3, threshold=0.2, fused=False, max_tile_rows=32),
         berhu_loss_ref(tgt3, prd3, msk3, threshold=0.2)),
        (berhu_loss(tgt3, prd3, threshold=0.2, fused=False, max_tile_rows=32),
         berhu_loss_ref(tgt3, prd3, None, threshold=0.2)),
        # forced tiled path on the exactly-divisible shape (no tail mask)
        (berhu_loss(target, pred, mask, threshold=0.2, fused=False),
         berhu_loss_ref(target, pred, mask, threshold=0.2)),
    ]

    for got, want in checks:
        got = jax.block_until_ready(got)
        assert jnp.allclose(got, want, rtol=1e-4, atol=1e-6), (got, want)

    print("KERNEL_OK")
</pallas_src>

<mosaic_0001>
module attributes {stable_mosaic.version = 11 : i64} {
  func.func @_fused_kernel(%arg0: i32, %arg1: memref<16x128xf32, #tpu.memory_space<any>>, %arg2: memref<16x128xf32, #tpu.memory_space<any>>, %arg3: memref<16x128xi8, #tpu.memory_space<any>>, %arg4: memref<8x128xf32, #tpu.memory_space<vmem>>, %arg5: memref<16x128xf32, #tpu.memory_space<vmem>>, %arg6: memref<16x128xf32, #tpu.memory_space<vmem>>, %arg7: memref<16x128xi8, #tpu.memory_space<vmem>>, %arg8: memref<3x!tpu.dma_semaphore, #tpu.memory_space<semaphore_mem>>) attributes {dimension_semantics = [#tpu.dimension_semantics<arbitrary>], iteration_bounds = array<i64: 1>, scalar_prefetch = 0 : i64, scratch_operands = 4 : i64, tpu.core_type = #tpu.core_type<tc>, window_params = [{}, {}, {}, {pipeline_mode = #tpu.pipeline_mode<synchronous>, transform_indices = @transform_3, window_bounds = array<i64: 8, 128>}]} {
    %c0_i32 = arith.constant 0 : i32
    %0 = tpu.memref_slice %arg8[%c0_i32] : memref<3x!tpu.dma_semaphore, #tpu.memory_space<semaphore_mem>> -> memref<1x!tpu.dma_semaphore, #tpu.memory_space<semaphore_mem>>
    %1 = tpu.memref_squeeze %0 : memref<1x!tpu.dma_semaphore, #tpu.memory_space<semaphore_mem>> -> memref<!tpu.dma_semaphore, #tpu.memory_space<semaphore_mem>>
    tpu.enqueue_dma source(%arg1 : memref<16x128xf32, #tpu.memory_space<any>>) target(%arg5 : memref<16x128xf32, #tpu.memory_space<vmem>>) target_semaphore(%1 : memref<!tpu.dma_semaphore, #tpu.memory_space<semaphore_mem>>)
    %c1_i32 = arith.constant 1 : i32
    %2 = tpu.memref_slice %arg8[%c1_i32] : memref<3x!tpu.dma_semaphore, #tpu.memory_space<semaphore_mem>> -> memref<1x!tpu.dma_semaphore, #tpu.memory_space<semaphore_mem>>
    %3 = tpu.memref_squeeze %2 : memref<1x!tpu.dma_semaphore, #tpu.memory_space<semaphore_mem>> -> memref<!tpu.dma_semaphore, #tpu.memory_space<semaphore_mem>>
    tpu.enqueue_dma source(%arg2 : memref<16x128xf32, #tpu.memory_space<any>>) target(%arg6 : memref<16x128xf32, #tpu.memory_space<vmem>>) target_semaphore(%3 : memref<!tpu.dma_semaphore, #tpu.memory_space<semaphore_mem>>)
    %c2_i32 = arith.constant 2 : i32
    %4 = tpu.memref_slice %arg8[%c2_i32] : memref<3x!tpu.dma_semaphore, #tpu.memory_space<semaphore_mem>> -> memref<1x!tpu.dma_semaphore, #tpu.memory_space<semaphore_mem>>
    %5 = tpu.memref_squeeze %4 : memref<1x!tpu.dma_semaphore, #tpu.memory_space<semaphore_mem>> -> memref<!tpu.dma_semaphore, #tpu.memory_space<semaphore_mem>>
    tpu.enqueue_dma source(%arg3 : memref<16x128xi8, #tpu.memory_space<any>>) target(%arg7 : memref<16x128xi8, #tpu.memory_space<vmem>>) target_semaphore(%5 : memref<!tpu.dma_semaphore, #tpu.memory_space<semaphore_mem>>)
    %c0_i32_0 = arith.constant 0 : i32
    %6 = tpu.memref_slice %arg8[%c0_i32_0] : memref<3x!tpu.dma_semaphore, #tpu.memory_space<semaphore_mem>> -> memref<1x!tpu.dma_semaphore, #tpu.memory_space<semaphore_mem>>
    %7 = tpu.memref_squeeze %6 : memref<1x!tpu.dma_semaphore, #tpu.memory_space<semaphore_mem>> -> memref<!tpu.dma_semaphore, #tpu.memory_space<semaphore_mem>>
    tpu.wait_dma2 semaphore(%7 : memref<!tpu.dma_semaphore, #tpu.memory_space<semaphore_mem>>) src(%arg1 : memref<16x128xf32, #tpu.memory_space<any>>) dst(%arg5 : memref<16x128xf32, #tpu.memory_space<vmem>>)
    %c1_i32_1 = arith.constant 1 : i32
    %8 = tpu.memref_slice %arg8[%c1_i32_1] : memref<3x!tpu.dma_semaphore, #tpu.memory_space<semaphore_mem>> -> memref<1x!tpu.dma_semaphore, #tpu.memory_space<semaphore_mem>>
    %9 = tpu.memref_squeeze %8 : memref<1x!tpu.dma_semaphore, #tpu.memory_space<semaphore_mem>> -> memref<!tpu.dma_semaphore, #tpu.memory_space<semaphore_mem>>
    tpu.wait_dma2 semaphore(%9 : memref<!tpu.dma_semaphore, #tpu.memory_space<semaphore_mem>>) src(%arg2 : memref<16x128xf32, #tpu.memory_space<any>>) dst(%arg6 : memref<16x128xf32, #tpu.memory_space<vmem>>)
    %c2_i32_2 = arith.constant 2 : i32
    %10 = tpu.memref_slice %arg8[%c2_i32_2] : memref<3x!tpu.dma_semaphore, #tpu.memory_space<semaphore_mem>> -> memref<1x!tpu.dma_semaphore, #tpu.memory_space<semaphore_mem>>
    %11 = tpu.memref_squeeze %10 : memref<1x!tpu.dma_semaphore, #tpu.memory_space<semaphore_mem>> -> memref<!tpu.dma_semaphore, #tpu.memory_space<semaphore_mem>>
    tpu.wait_dma2 semaphore(%11 : memref<!tpu.dma_semaphore, #tpu.memory_space<semaphore_mem>>) src(%arg3 : memref<16x128xi8, #tpu.memory_space<any>>) dst(%arg7 : memref<16x128xi8, #tpu.memory_space<vmem>>)
    %c0 = arith.constant 0 : index
    %c0_3 = arith.constant 0 : index
    %12 = vector.load %arg5[%c0, %c0_3] : memref<16x128xf32, #tpu.memory_space<vmem>>, vector<16x128xf32>
    %c0_4 = arith.constant 0 : index
    %c0_5 = arith.constant 0 : index
    %13 = vector.load %arg6[%c0_4, %c0_5] : memref<16x128xf32, #tpu.memory_space<vmem>>, vector<16x128xf32>
    %cst = arith.constant 0.000000e+00 : f32
    %14 = vector.broadcast %cst : f32 to vector<16x128xf32>
    %15 = arith.cmpf ogt, %12, %14 : vector<16x128xf32>
    %c0_6 = arith.constant 0 : index
    %c0_7 = arith.constant 0 : index
    %16 = vector.load %arg7[%c0_6, %c0_7] : memref<16x128xi8, #tpu.memory_space<vmem>>, vector<16x128xi8>
    %c0_i8 = arith.constant 0 : i8
    %17 = vector.broadcast %c0_i8 : i8 to vector<16x128xi8>
    %18 = arith.cmpi ne, %16, %17 : vector<16x128xi8>
    %19 = arith.andi %15, %18 : vector<16x128xi1>
    %20 = arith.subf %12, %13 : vector<16x128xf32>
    %21 = math.absf %20 : vector<16x128xf32>
    %cst_8 = arith.constant 0.000000e+00 : f32
    %22 = vector.broadcast %cst_8 : f32 to vector<16x128xf32>
    %23 = arith.select %19, %21, %22 : vector<16x128xi1>, vector<16x128xf32>
    %24 = vector.shape_cast %23 : vector<16x128xf32> to vector<1x16x128xf32>
    %cst_9 = arith.constant dense<0xFF800000> : vector<1xf32>
    %25 = vector.multi_reduction <maximumf>, %24, %cst_9 [1, 2] : vector<1x16x128xf32> to vector<1xf32>
    %26 = vector.shape_cast %25 : vector<1xf32> to vector<1x1x1xf32>
    %27 = vector.extract %26[0, 0, 0] : f32 from vector<1x1x1xf32>
    %cst_10 = arith.constant 2.000000e-01 : f32
    %28 = arith.mulf %cst_10, %27 : f32
    %cst_11 = arith.constant 5.000000e-01 : f32
    %29 = arith.divf %cst_11, %28 : f32
    %30 = vector.broadcast %28 : f32 to vector<16x128xf32>
    %31 = arith.cmpf olt, %23, %30 : vector<16x128xf32>
    %cst_12 = arith.constant 0.000000e+00 : f32
    %32 = vector.broadcast %cst_12 : f32 to vector<16x128xf32>
    %33 = arith.select %31, %23, %32 : vector<16x128xi1>, vector<16x128xf32>
    %34 = vector.broadcast %28 : f32 to vector<16x128xf32>
    %35 = arith.cmpf ogt, %23, %34 : vector<16x128xf32>
    %36 = arith.mulf %23, %23 : vector<16x128xf32>
    %37 = arith.mulf %28, %28 : f32
    %38 = vector.broadcast %37 : f32 to vector<16x128xf32>
    %39 = arith.addf %36, %38 : vector<16x128xf32>
    %40 = vector.broadcast %29 : f32 to vector<16x128xf32>
    %41 = arith.mulf %39, %40 : vector<16x128xf32>
    %cst_13 = arith.constant 0.000000e+00 : f32
    %42 = vector.broadcast %cst_13 : f32 to vector<16x128xf32>
    %43 = arith.select %35, %41, %42 : vector<16x128xi1>, vector<16x128xf32>
    %44 = arith.addf %33, %43 : vector<16x128xf32>
    %45 = vector.shape_cast %44 : vector<16x128xf32> to vector<1x16x128xf32>
    %cst_14 = arith.constant dense<0.000000e+00> : vector<1xf32>
    %46 = vector.multi_reduction <add>, %45, %cst_14 [1, 2] : vector<1x16x128xf32> to vector<1xf32>
    %47 = vector.shape_cast %46 : vector<1xf32> to vector<1x1x1xf32>
    %48 = vector.extract %47[0, 0, 0] : f32 from vector<1x1x1xf32>
    %49 = arith.extui %19 : vector<16x128xi1> to vector<16x128xi32>
    %50 = arith.sitofp %49 : vector<16x128xi32> to vector<16x128xf32>
    %51 = vector.shape_cast %50 : vector<16x128xf32> to vector<1x16x128xf32>
    %cst_15 = arith.constant dense<0.000000e+00> : vector<1xf32>
    %52 = vector.multi_reduction <add>, %51, %cst_15 [1, 2] : vector<1x16x128xf32> to vector<1xf32>
    %53 = vector.shape_cast %52 : vector<1xf32> to vector<1x1x1xf32>
    %54 = vector.extract %53[0, 0, 0] : f32 from vector<1x1x1xf32>
    %55 = arith.divf %48, %54 : f32
    %56 = vector.broadcast %55 : f32 to vector<8x128xf32>
    %c0_16 = arith.constant 0 : index
    %c0_17 = arith.constant 0 : index
    %57 = vector.load %arg4[%c0_16, %c0_17] : memref<8x128xf32, #tpu.memory_space<vmem>>, vector<8x128xf32>
    tpu.vector_store %arg4[%c0_16, %c0_17], %56 {strides = array<i32>} : memref<8x128xf32, #tpu.memory_space<vmem>>, vector<8x128xf32>,
    return
  }
  func.func @transform_3(%arg0: i32) -> (i32, i32) {
    %c0_i32 = arith.constant 0 : i32
    %c0_i32_0 = arith.constant 0 : i32
    %c0_i32_1 = arith.constant 0 : i32
    return %c0_i32, %c0_i32_0 : i32, i32
  }
}

</mosaic_0001>

<bundles_post_ra>
// kernel: berhu_loss.1
= control target key start
LH: loop header
LB: loop body
LE: loop exit
PB: predicated region body
PF: predicated region fallthrough
CT: control target
= control target key end

     0   :  { %s359_s0 = inlined_call_operand.vmem [shape: f32[16,128], index: 0, kind: input, shape index: {}]   ;;  %s360_s1 = inlined_call_operand.vmem [shape: f32[16,128], index: 1, kind: input, shape index: {}]   ;;  %s361_s2 = inlined_call_operand.vmem [shape: s8[16,128], index: 2, kind: input, shape index: {}]   ;;  %s362_s3 = inlined_call_operand.vmem [shape: f32[8,128], index: 3, kind: output, shape index: {}]  }
   0x1   :  { %v42_v0 = vld [vmem:[%s359_s0] sm:$0xff]  ;;  %v44_v1 = vld [vmem:[%s359_s0 + $0x8] sm:$0xff] }
   0x2   :  { %53 = vsyncadd [#allocation5], 256  ;;  %v87_v2 = vld [vmem:[%s360_s1] sm:$0xff]  ;;  %v89_v3 = vld [vmem:[%s360_s1 + $0x8] sm:$0xff] }
   0x3   :  { %98 = vsyncadd [#allocation5 + $0x1], 256  ;;  %v117_v4 = vld [vmem:[%s361_s2] sm:$0xf] }
   0x4   :  { %118 = vst [vmem:[#allocation4] sm:$0xf] %v117_v4 }
   0x5   :  { %143 = vsyncadd [#allocation5 + $0x2], 64 }
   0x6   :  { %313 = dma.done.wait [#allocation5], 256 }
   0x7   :  { %314 = vsyncadd [#allocation5], 4294967040 }
   0x8   :  { %315 = dma.done.wait [#allocation5 + $0x1], 256 }
   0x9   :  { %316 = vsyncadd [#allocation5 + $0x1], 4294967040 }
   0xa   :  { %317 = dma.done.wait [#allocation5 + $0x2], 64 }
   0xb   :  { %318 = vsyncadd [#allocation5 + $0x2], 4294967232  ;;  %v171_v5 = vsub.f32 %v42_v0, %v87_v2  ;;  %v159_v6 = vld [vmem:[#allocation4] sm:$0x3]  ;;  %v160_v7 = vld [vmem:[#allocation4 + $0x2] sm:$0x3]  ;;  %v172_v8 = vsub.f32 %v44_v1, %v89_v3 }
   0xc   :  { %vm161_vm0 = vnez %v159_v6  ;;  %vm162_vm1 = vnez %v160_v7  ;;  %v319_v9 = vmov 0   ;;  %vm157_vm2 = vcmp.gt.f32.partialorder %v42_v0, 0.0 }
   0xd   :  { %v163_v10 = vsel %vm161_vm0, 16843009, %v319_v9  ;;  %v164_v11 = vsel %vm162_vm1, 16843009, %v319_v9  ;;  %v173_v14 = vand.u32 2147483647, %v171_v5 }
   0xe   :  { %v165_v12 = vunpack.c.0.s8 %v163_v10  ;;  %v166_v13 = vunpack.c.0.s8 %v164_v11  ;;  %vm158_vm3 = vcmp.gt.f32.partialorder %v44_v1, 0.0  ;;  %v174_v15 = vand.u32 2147483647, %v172_v8 }
   0xf   :  { %v320_v20 = vmov 0.0  }
  0x10   :  { %vm167_vm4 = vcmp.ne.s32.totalorder %v165_v12, 0  ;;  %vm168_vm5 = vcmp.ne.s32.totalorder %v166_v13, 0 }
  0x11   :  { %vm169_vm6 = vmand %vm157_vm2, %vm167_vm4 }
  0x12   :  { %vm170_vm7 = vmand %vm158_vm3, %vm168_vm5  ;;  %v175_v16 = vsel %vm169_vm6, %v173_v14, 0.0  ;;  %v292_v21 = vsel %vm169_vm6, 1.0, %v320_v20 }
  0x13   :  { %v176_v17 = vsel %vm170_vm7, %v174_v15, 0.0  ;;  %v293_v22 = vsel %vm170_vm7, 1.0, %v320_v20  ;;  %v199_v32 = vmul.f32 %v175_v16, %v175_v16 }
  0x14   :  { %v177_v18 = vmax.f32 %v175_v16, %v176_v17  ;;  %v226_v24 = vadd.f32 %v293_v22, %v292_v21  ;;  %v200_v33 = vmul.f32 %v176_v17, %v176_v17 }
  0x16   :  { %178 = vmax.xlane.f32.xlu0 %v177_v18  ;;  %227 = vadd.xlane.f32.xlu1 %v226_v24 }
  0xa3   :  { %v179_v19 = vpop.xlane.xlu0 %178  ;;  %v228_v47 = vpop.xlane.xlu1 %227 }
  0xa4   :  { %v180_v23 = vrot.slane %v179_v19, 4  ;;  %v229_v48 = vrot.slane %v228_v47, 4 }
  0xa6   :  { %v181_v25 = vmax.f32 %v179_v19, %v180_v23  ;;  %v230_v49 = vadd.f32 %v229_v48, %v228_v47 }
  0xa8   :  { %v182_v26 = vrot.slane %v181_v25, 2  ;;  %v231_v50 = vrot.slane %v230_v49, 2 }
  0xaa   :  { %v183_v27 = vmax.f32 %v181_v25, %v182_v26  ;;  %v232_v54 = vadd.f32 %v231_v50, %v230_v49 }
  0xac   :  { %v184_v28 = vrot.slane %v183_v27, 1  ;;  %v233_v57 = vrot.slane %v232_v54, 1 }
  0xae   :  { %v185_v29 = vmax.f32 %v183_v27, %v184_v28  ;;  %v234_v60 = vadd.f32 %v233_v57, %v232_v54 }
  0xb0   :  { %297 = vpush %v185_v29 }
  0xe1   :  { %s298_s0 = spop %297 }
  0xe2   :  { %s187_s1 = smul.f32 0.2, %s298_s0 }
  0xe4   :  { %v188_v30 = vstv %s187_s1  ;;  %s201_s2 = smul.f32 %s187_s1, %s187_s1 }
  0xe5   :  { %309 = vrcp.f32 %v188_v30  ;;  %vm193_vm8 = vcmp.lt.f32.partialorder %v175_v16, %v188_v30  ;;  %vm194_vm9 = vcmp.lt.f32.partialorder %v176_v17, %v188_v30  ;;  %vm197_vm10 = vcmp.gt.f32.partialorder %v175_v16, %v188_v30 }
  0xe6   :  { %v202_v34 = vstv %s201_s2  ;;  %vm198_vm11 = vcmp.gt.f32.partialorder %v176_v17, %v188_v30  ;;  %v195_v42 = vsel %vm193_vm8, %v175_v16, 0.0  ;;  %v196_v43 = vsel %vm194_vm9, %v176_v17, 0.0 }
  0xe7   :  { %v203_v35 = vadd.f32 %v202_v34, %v199_v32  ;;  %v204_v36 = vadd.f32 %v202_v34, %v200_v33 }
  0xef   :  { %v310_v31 = vpop.eup %309 }
  0xf0   :  { %299 = vpush %v310_v31 }
 0x121   :  { %s300_s22 = spop %299 }
 0x122   :  { %s191_s23 = smul.f32 0.5, %s300_s22 }
 0x124   :  { %v205_v37 = vstv %s191_s23 }
 0x125   :  { %v206_v38 = vmul.f32 %v205_v37, %v203_v35  ;;  %v207_v39 = vmul.f32 %v205_v37, %v204_v36 }
 0x127   :  { %v208_v40 = vsel %vm197_vm10, %v206_v38, 0.0  ;;  %v209_v41 = vsel %vm198_vm11, %v207_v39, 0.0 }
 0x128   :  { %v210_v44 = vadd.f32 %v208_v40, %v195_v42  ;;  %v211_v45 = vadd.f32 %v209_v41, %v196_v43 }
 0x12a   :  { %v212_v46 = vadd.f32 %v211_v45, %v210_v44 }
 0x12c   :  { %213 = vadd.xlane.f32.xlu0 %v212_v46 }
 0x1b9   :  { %v214_v51 = vpop.xlane.xlu0 %213 }
 0x1ba   :  { %v215_v52 = vrot.slane %v214_v51, 4 }
 0x1bc   :  { %v216_v53 = vadd.f32 %v215_v52, %v214_v51 }
 0x1be   :  { %v217_v55 = vrot.slane %v216_v53, 2 }
 0x1c0   :  { %v218_v56 = vadd.f32 %v217_v55, %v216_v53 }
 0x1c2   :  { %v219_v58 = vrot.slane %v218_v56, 1 }
 0x1c4   :  { %v220_v59 = vadd.f32 %v219_v58, %v218_v56 }
 0x1c6   :  { %301 = vpush %v220_v59 }
 0x1c7   :  { %303 = vpush %v234_v60 }
 0x1f7   :  { %s302_s24 = spop %301 }
 0x1f8   :  { %s304_s25 = spop %303 }
 0x1f9   :  { %v236_v61 = vstv %s304_s25 }
 0x1fa   :  { %311 = vrcp.f32 %v236_v61 }
 0x204   :  { %v312_v62 = vpop.eup %311 }
 0x205   :  { %305 = vpush %v312_v62 }
 0x236   :  { %s306_s26 = spop %305 }
 0x237   :  { %s239_s27 = smul.f32 %s306_s26, %s302_s24 }
 0x239   :  { %v240_v63 = vstv %s239_s27 }
 0x23a   :  { %241 = vst [vmem:[%s362_s3] sm:$0xff] %v240_v63 }
 0x23b   :  { %246 = vsyncmov [#allocation5] }
 0x23e   :  { %s247_s30 = vpop.sfrf %246 }
 0x23f   :  { %p294_p0 = scmp.ne.s32.totalorder %s247_s30, 0 }
 0x241   :  { %251 = shalt.err (%p294_p0)  }
 0x242   :  { %253 = vsyncmov [#allocation5 + $0x1] }
 0x245   :  { %s254_s4 = vpop.sfrf %253 }
 0x246   :  { %p295_p1 = scmp.ne.s32.totalorder %s254_s4, 0 }
 0x248   :  { %258 = shalt.err (%p295_p1)  }
 0x249   :  { %260 = vsyncmov [#allocation5 + $0x2] }
 0x24c   :  { %s261_s5 = vpop.sfrf %260 }
 0x24d   :  { %p296_p2 = scmp.ne.s32.totalorder %s261_s5, 0 }
 0x24f   :  { %265 = shalt.err (%p296_p2)  }

</bundles_post_ra>
